<compile_context>
chip_gen: v7x
topology: tpu7x:2x2x1
jax: 0.10.0
libtpu: 0.0.40
codegen_flags: <defaults>
</compile_context>

<pallas_src>
import jax
import jax.numpy as jnp
from jax.experimental import pallas as pl
from jax.experimental.pallas import tpu as pltpu

LANE = 128


def _round_up(x, m):
    return (x + m - 1) // m * m


def _vmem_budget_bytes():
    """Conservative per-kernel VMEM budget for the pipelined data blocks."""
    cap = None
    try:
        cap = getattr(pltpu.get_tpu_info(), "vmem_capacity_bytes", None)
    except Exception:
        cap = None
    if not cap:
        cap = 64 * 1024 * 1024          # v7x physical VMEM (smallest generation)
    return cap // 8                      # generous headroom for weights/compiler scratch


def _choose_tile_b(batch, per_row_bytes, vmem_budget):
    """Largest sublane-legal batch tile that fits the VMEM budget, preferring a
    grid of >= 2 steps (v7x megacore sharding + DMA/compute pipelining)."""
    if batch <= 8 or batch % 8 != 0:
        return batch                     # whole batch in one block (full-dim block is legal)
    cands = [c for c in (256, 128, 64, 32, 16, 8) if batch % c == 0]
    fits = [c for c in cands if c * per_row_bytes <= vmem_budget] or [cands[-1]]
    multi = [c for c in fits if batch // c >= 2]
    return multi[0] if multi else fits[0]


# ------------------------------ Fused kernel ------------------------------- #

def _convnet_kernel(x_ref, w_conv_ref, b_conv_ref, w_fc_ref, b_fc_ref, out_ref):
    # x: (tb, S*Cin) f32.  Conv1d(VALID) + ReLU + Linear as two MXU matmuls; the
    # conv weight is block-Toeplitz, so the activation comes out already flattened
    # as densely packed (l, h) pairs -- no slices, no reshapes, no relayouts.
    x = x_ref[...].astype(jnp.bfloat16)
    h = jnp.dot(x, w_conv_ref[...], preferred_element_type=jnp.float32)   # (tb, L*H)
    h = jnp.maximum(h + b_conv_ref[...], 0.0)           # f32 epilogue (v5e-safe)
    out = jnp.dot(h.astype(jnp.bfloat16), w_fc_ref[...],
                  preferred_element_type=jnp.float32)   # (tb, O_pad)
    out_ref[...] = out + b_fc_ref[...]                  # lane-dense unmasked store


# ------------------------------ Model wrapper ------------------------------ #

class ConvNetPallas:
    """Mirrors the PyTorch ConvNet forward pass."""

    def __init__(self, input_size, hidden_size, output_size, kernel_size, seq_length, key):
        self.input_size = input_size
        self.hidden_size = hidden_size
        self.output_size = output_size
        self.kernel_size = kernel_size
        self.seq_length = seq_length
        self.l_out = seq_length - kernel_size + 1
        self.output_pad = _round_up(output_size, LANE)

        k1, k2, k3, k4 = jax.random.split(key, 4)
        # PyTorch-style default init: U(-1/sqrt(fan_in), 1/sqrt(fan_in)).
        conv_fan_in = input_size * kernel_size
        cb = 1.0 / (conv_fan_in ** 0.5)
        # torch Conv1d weight layout: (out_channels, in_channels, kernel_size)
        self.w_conv = jax.random.uniform(k1, (hidden_size, input_size, kernel_size),
                                         jnp.float32, minval=-cb, maxval=cb)
        self.b_conv = jax.random.uniform(k2, (hidden_size,), jnp.float32,
                                         minval=-cb, maxval=cb)

        fc_fan_in = hidden_size * self.l_out
        fb = 1.0 / (fc_fan_in ** 0.5)
        # torch Linear weight: (out_features, in_features), in_features flat = h*L + l
        self.w_fc = jax.random.uniform(k3, (output_size, fc_fan_in), jnp.float32,
                                       minval=-fb, maxval=fb)
        self.b_fc = jax.random.uniform(k4, (output_size,), jnp.float32,
                                       minval=-fb, maxval=fb)

        S, Cin, H, K = seq_length, input_size, hidden_size, kernel_size
        L, Op = self.l_out, self.output_pad

        # --- Block-Toeplitz conv weight: one matmul computes the whole conv ------
        # w_big[s*Cin + ci, l*H + h] = w_conv[h, ci, s - l]  for l <= s < l+K, else 0.
        wt = jnp.transpose(self.w_conv, (2, 1, 0))                 # (K, Cin, H)
        w_big = jnp.zeros((S, Cin, L, H), jnp.float32)
        for l in range(L):                                          # host-side, once
            w_big = w_big.at[l:l + K, :, l, :].set(wt)
        self.w_big = w_big.reshape(S * Cin, L * H).astype(jnp.bfloat16)
        # Conv bias broadcast over positions: index (l*H + h) -> b_conv[h].
        self.b_conv2 = jnp.tile(self.b_conv, L).reshape(1, L * H)

        # --- fc weight with rows indexed (l, h), densely packed (no hidden pad) ---
        # Reproduces torch's channel-major .view(): in_feature flat index = h*L + l.
        wf = self.w_fc.reshape(output_size, H, L)                   # (O, H, L)
        wf = jnp.transpose(wf, (2, 1, 0))                           # (L, H, O)
        wf = jnp.pad(wf, ((0, 0), (0, 0), (0, Op - output_size)))   # pad out-features only
        self.w_fc2 = wf.reshape(L * H, Op).astype(jnp.bfloat16)
        self.b_fc2 = jnp.pad(self.b_fc, (0, Op - output_size)).reshape(1, Op)

        # Per-batch-row live VMEM estimate: double-buffered x/out blocks, bf16 copies,
        # and the f32+bf16 activation.
        self._per_row_bytes = (S * Cin * 4 * 2 + S * Cin * 2
                               + L * H * (4 + 2)
                               + Op * 4 * 2)
        self._vmem_budget = _vmem_budget_bytes()
        self._weight_bytes = int(self.w_big.size * 2 + self.w_fc2.size * 2
                                 + self.b_conv2.size * 4 + self.b_fc2.size * 4)

    def __call__(self, x, *, padded=False):
        # x: (B, seq_length, input_size)
        b, s, cin = x.shape
        assert s == self.seq_length and cin == self.input_size
        x_flat = x.reshape(b, s * cin)            # contiguous reshape: no data movement
        L, H, Op = self.l_out, self.hidden_size, self.output_pad

        tb = _choose_tile_b(b, self._per_row_bytes, self._vmem_budget)
        grid = (b // tb,)

        flops = 2 * b * (s * cin) * (L * H) + 2 * b * (L * H) * Op
        bytes_accessed = x_flat.size * 4 + self._weight_bytes + b * Op * 4

        out_pad = pl.pallas_call(
            _convnet_kernel,
            out_shape=jax.ShapeDtypeStruct((b, Op), jnp.float32),
            grid_spec=pltpu.PrefetchScalarGridSpec(
                num_scalar_prefetch=0,
                grid=grid,
                in_specs=[
                    pl.BlockSpec((tb, s * cin), lambda i: (i, 0)),
                    pl.BlockSpec((s * cin, L * H), lambda i: (0, 0)),
                    pl.BlockSpec((1, L * H), lambda i: (0, 0)),
                    pl.BlockSpec((L * H, Op), lambda i: (0, 0)),
                    pl.BlockSpec((1, Op), lambda i: (0, 0)),
                ],
                out_specs=pl.BlockSpec((tb, Op), lambda i: (i, 0)),
            ),
            compiler_params=pltpu.CompilerParams(
                dimension_semantics=("parallel",),
                vmem_limit_bytes=32 * 1024 * 1024),
            cost_estimate=pl.CostEstimate(
                flops=flops, transcendentals=0, bytes_accessed=bytes_accessed),
        )(x_flat, self.w_big, self.b_conv2, self.w_fc2, self.b_fc2)

        if padded:
            # Avoid the extra HBM read/write of the narrow slice; consumers can fuse
            # the :output_size slice into their next op.
            return out_pad
        return out_pad[:, :self.output_size]


# --------------------------- References for checking ----------------------- #

def _reference_forward(x, w_conv, b_conv, w_fc, b_fc):
    """Pure-f32 reference with exact torch ConvNet.forward semantics."""
    xt = jnp.transpose(x, (0, 2, 1))  # (B, Cin, S)
    out = jax.lax.conv_general_dilated(
        xt, w_conv, window_strides=(1,), padding="VALID",
        dimension_numbers=("NCH", "OIH", "NCH"))
    out = jnp.maximum(out + b_conv[None, :, None], 0.0)
    out = out.reshape(x.shape[0], -1)  # torch .view: channel-major flatten
    return out @ w_fc.T + b_fc


def _emulated_forward(x, model):
    """Same bf16/f32 math as the kernel, in plain JAX (tight-tolerance check)."""
    x_flat = x.reshape(x.shape[0], -1).astype(jnp.bfloat16)
    h = jnp.dot(x_flat, model.w_big, preferred_element_type=jnp.float32)
    h = jnp.maximum(h + model.b_conv2, 0.0)
    out = jnp.dot(h.astype(jnp.bfloat16), model.w_fc2,
                  preferred_element_type=jnp.float32) + model.b_fc2
    return out[:, :model.output_size]


# ----------------------------------- Main ----------------------------------- #

if __name__ == "__main__":
    batch = 2
    input_size = 4
    hidden_size = 32
    output_size = 10
    kernel_size = 3
    seq_length = 8

    key = jax.random.PRNGKey(0)
    k_param, k_x = jax.random.split(key)

    model = ConvNetPallas(input_size, hidden_size, output_size,
                          kernel_size, seq_length, k_param)

    x = jax.random.normal(k_x, (batch, seq_length, input_size), jnp.float32)

    out = jax.block_until_ready(model(x))
    assert out.shape == (batch, output_size)

    # Tight check against a reference using the exact same bf16/f32 numerics.
    ref_emu = _emulated_forward(x, model)
    assert jnp.allclose(out, ref_emu, atol=2e-3, rtol=2e-3), "mismatch vs bf16 reference"

    # Loose check against the pure-f32 torch-semantics reference (bf16 MXU operands).
    ref_f32 = _reference_forward(x, model.w_conv, model.b_conv, model.w_fc, model.b_fc)
    assert jnp.allclose(out, ref_f32, atol=5e-2, rtol=5e-2), "mismatch vs f32 reference"

    print("KERNEL_OK")
</pallas_src>

<mosaic_0001>
module attributes {stable_mosaic.version = 11 : i64} {
  func.func @_convnet_kernel(%arg0: i32, %arg1: memref<2x32xf32, #tpu.memory_space<vmem>>, %arg2: memref<32x192xbf16, #tpu.memory_space<vmem>>, %arg3: memref<1x192xf32, #tpu.memory_space<vmem>>, %arg4: memref<192x128xbf16, #tpu.memory_space<vmem>>, %arg5: memref<1x128xf32, #tpu.memory_space<vmem>>, %arg6: memref<2x128xf32, #tpu.memory_space<vmem>>) attributes {dimension_semantics = [#tpu.dimension_semantics<parallel>], iteration_bounds = array<i64: 1>, scalar_prefetch = 0 : i64, scratch_operands = 0 : i64, tpu.core_type = #tpu.core_type<tc>, window_params = [{transform_indices = @transform_0, window_bounds = array<i64: 2, 32>}, {pipeline_mode = #tpu.pipeline_mode<synchronous>, transform_indices = @transform_1, window_bounds = array<i64: 32, 192>}, {pipeline_mode = #tpu.pipeline_mode<synchronous>, transform_indices = @transform_2, window_bounds = array<i64: 1, 192>}, {pipeline_mode = #tpu.pipeline_mode<synchronous>, transform_indices = @transform_3, window_bounds = array<i64: 192, 128>}, {pipeline_mode = #tpu.pipeline_mode<synchronous>, transform_indices = @transform_4, window_bounds = array<i64: 1, 128>}, {transform_indices = @transform_5, window_bounds = array<i64: 2, 128>}]} {
    %c0 = arith.constant 0 : index
    %c0_0 = arith.constant 0 : index
    %0 = vector.load %arg1[%c0, %c0_0] : memref<2x32xf32, #tpu.memory_space<vmem>>, vector<2x32xf32>
    %1 = arith.truncf %0 : vector<2x32xf32> to vector<2x32xbf16>
    %c0_1 = arith.constant 0 : index
    %c0_2 = arith.constant 0 : index
    %2 = vector.load %arg2[%c0_1, %c0_2] : memref<32x192xbf16, #tpu.memory_space<vmem>>, vector<32x192xbf16>
    %cst = arith.constant dense<0.000000e+00> : vector<2x192xf32>
    %3 = tpu.matmul %1, %2, %cst {dimension_numbers = #tpu.dot_dimension_numbers<[1], [0], [0], [1], [0, 0, 1, 1], [], []>} : vector<2x32xbf16>, vector<32x192xbf16>, vector<2x192xf32> -> vector<2x192xf32>
    %c0_3 = arith.constant 0 : index
    %c0_4 = arith.constant 0 : index
    %4 = vector.load %arg3[%c0_3, %c0_4] : memref<1x192xf32, #tpu.memory_space<vmem>>, vector<1x192xf32>
    %5 = vector.broadcast %4 : vector<1x192xf32> to vector<2x192xf32>
    %6 = arith.addf %3, %5 : vector<2x192xf32>
    %cst_5 = arith.constant 0.000000e+00 : f32
    %7 = vector.broadcast %cst_5 : f32 to vector<2x192xf32>
    %8 = arith.maximumf %6, %7 : vector<2x192xf32>
    %9 = arith.truncf %8 : vector<2x192xf32> to vector<2x192xbf16>
    %c0_6 = arith.constant 0 : index
    %c0_7 = arith.constant 0 : index
    %10 = vector.load %arg4[%c0_6, %c0_7] : memref<192x128xbf16, #tpu.memory_space<vmem>>, vector<192x128xbf16>
    %cst_8 = arith.constant dense<0.000000e+00> : vector<2x128xf32>
    %11 = tpu.matmul %9, %10, %cst_8 {dimension_numbers = #tpu.dot_dimension_numbers<[1], [0], [0], [1], [0, 0, 1, 1], [], []>} : vector<2x192xbf16>, vector<192x128xbf16>, vector<2x128xf32> -> vector<2x128xf32>
    %c0_9 = arith.constant 0 : index
    %c0_10 = arith.constant 0 : index
    %12 = vector.load %arg5[%c0_9, %c0_10] : memref<1x128xf32, #tpu.memory_space<vmem>>, vector<1x128xf32>
    %13 = vector.broadcast %12 : vector<1x128xf32> to vector<2x128xf32>
    %14 = arith.addf %11, %13 : vector<2x128xf32>
    %c0_11 = arith.constant 0 : index
    %c0_12 = arith.constant 0 : index
    %15 = vector.load %arg6[%c0_11, %c0_12] : memref<2x128xf32, #tpu.memory_space<vmem>>, vector<2x128xf32>
    tpu.vector_store %arg6[%c0_11, %c0_12], %14 {strides = array<i32>} : memref<2x128xf32, #tpu.memory_space<vmem>>, vector<2x128xf32>,
    return
  }
  func.func @transform_0(%arg0: i32) -> (i32, i32) {
    %c0_i32 = arith.constant 0 : i32
    %c0_i32_0 = arith.constant 0 : i32
    return %arg0, %c0_i32 : i32, i32
  }
  func.func @transform_1(%arg0: i32) -> (i32, i32) {
    %c0_i32 = arith.constant 0 : i32
    %c0_i32_0 = arith.constant 0 : i32
    %c0_i32_1 = arith.constant 0 : i32
    return %c0_i32, %c0_i32_0 : i32, i32
  }
  func.func @transform_2(%arg0: i32) -> (i32, i32) {
    %c0_i32 = arith.constant 0 : i32
    %c0_i32_0 = arith.constant 0 : i32
    %c0_i32_1 = arith.constant 0 : i32
    return %c0_i32, %c0_i32_0 : i32, i32
  }
  func.func @transform_3(%arg0: i32) -> (i32, i32) {
    %c0_i32 = arith.constant 0 : i32
    %c0_i32_0 = arith.constant 0 : i32
    %c0_i32_1 = arith.constant 0 : i32
    return %c0_i32, %c0_i32_0 : i32, i32
  }
  func.func @transform_4(%arg0: i32) -> (i32, i32) {
    %c0_i32 = arith.constant 0 : i32
    %c0_i32_0 = arith.constant 0 : i32
    %c0_i32_1 = arith.constant 0 : i32
    return %c0_i32, %c0_i32_0 : i32, i32
  }
  func.func @transform_5(%arg0: i32) -> (i32, i32) {
    %c0_i32 = arith.constant 0 : i32
    %c0_i32_0 = arith.constant 0 : i32
    return %arg0, %c0_i32 : i32, i32
  }
}

</mosaic_0001>

<bundles_post_ra>
// kernel: tpu_custom_call.1
= control target key start
LH: loop header
LB: loop body
LE: loop exit
PB: predicated region body
PF: predicated region fallthrough
CT: control target
= control target key end

     0   :  { %10 = vsyncpa [#allocation3], 0  ;;  %s545_s0 = inlined_call_operand.hbm [shape: f32[2,32], index: 0, kind: input, shape index: {}]   ;;  %s546_s1 = inlined_call_operand.hbm [shape: bf16[32,192], index: 1, kind: input, shape index: {}]   ;;  %s547_s2 = inlined_call_operand.vmem [shape: f32[1,192], index: 2, kind: input, shape index: {}]   ;;  %s548_s3 = inlined_call_operand.hbm [shape: bf16[192,128], index: 3, kind: input, shape index: {}]   ;;  %s549_s4 = inlined_call_operand.vmem [shape: f32[1,128], index: 4, kind: input, shape index: {}]   ;;  %s550_s5 = inlined_call_operand.hbm [shape: f32[2,128], index: 5, kind: output, shape index: {}]  }
   0x1   :  { %11 = vsyncpa [#allocation6], 0 }
   0x2   :  { %12 = vsyncpa [#allocation4], 0  ;;  %s452_s18 = smov [#allocation5]   ;;  %s358_s22 = scalar_lea.hbm %s546_s1, 512 }
   0x3   :  { %s28_s19 = sshll.u32 %s452_s18, 4  ;;  %p359_p0 = scmp.ne.s32.totalorder %s546_s1, %s358_s22  ;;  %s29_s19 = int_to_ptr.vmem [resolvable:$true] %s28_s19 }
   0x4   :  { %p362_p1 = scmp.lt.u32.totalorder %s358_s22, %s546_s1 }
   0x6   :  { %p364_p2 = pnand %p362_p1, %p359_p0 }
   0x8   :  { %367 = shalt.err (!%p364_p2)
}
   0x9   :  { %s368_s27 = scalar_lea.vmem %s29_s19, 512  ;;  %p373_p4 = scmp.lt.s32.totalorder %s29_s19, %s29_s19 }
   0xa   :  { %p369_p3 = scmp.ne.s32.totalorder %s29_s19, %s368_s27  ;;  %p374_p5 = scmp.lt.s32.totalorder %s368_s27, %s368_s27 }
   0xc   :  { %p375_p6 = por %p374_p5, %p373_p4 }
   0xe   :  { %p376_p7 = pnand %p375_p6, %p369_p3 }
  0x10   :  { %379 = shalt.err (!%p376_p7)
}
  0x11   :  { %s453_s28 = smov 128   ;;  %s454_s29 = smov 8  }
  0x12   :  { %34 = dma.hbm_to_vmem [thread:$0]  %s546_s1, 512, %s29_s19, [#allocation6], %s453_s28, %s453_s28, %s454_s29  }
  0x13   :  { %s455_s7 = smov [#allocation2]   ;;  %s456_s9 = smov [#allocation7]  }
  0x14   :  { %s19_s8 = sshll.u32 %s455_s7, 4  ;;  %s42_s10 = sshll.u32 %s456_s9, 4  ;;  %s20_s8 = int_to_ptr.vmem [resolvable:$true] %s19_s8  ;;  %s43_s10 = int_to_ptr.vmem [resolvable:$true] %s42_s10 }
  0x15   :  { %s380_s13 = scalar_lea.hbm %s545_s0, 32 }
  0x16   :  { %p381_p8 = scmp.ne.s32.totalorder %s545_s0, %s380_s13  ;;  %p384_p9 = scmp.lt.u32.totalorder %s380_s13, %s545_s0 }
  0x18   :  { %p386_p10 = pnand %p384_p9, %p381_p8 }
  0x1a   :  { %389 = shalt.err (!%p386_p10)
}
  0x1b   :  { %s390_s1 = scalar_lea.vmem %s20_s8, 32  ;;  %p395_p12 = scmp.lt.s32.totalorder %s20_s8, %s20_s8 }
  0x1c   :  { %p391_p11 = scmp.ne.s32.totalorder %s20_s8, %s390_s1  ;;  %p396_p13 = scmp.lt.s32.totalorder %s390_s1, %s390_s1 }
  0x1e   :  { %p397_p0 = por %p396_p13, %p395_p12 }
  0x20   :  { %p398_p1 = pnand %p397_p0, %p391_p11 }
  0x22   :  { %401 = shalt.err (!%p398_p1)
}
  0x23   :  { %22 = dma.hbm_to_vmem [thread:$0]  %s545_s0, 32, %s20_s8, [#allocation3]  }
  0x24   :  { %s402_s22 = scalar_lea.hbm %s548_s3, 1536 }
  0x25   :  { %p403_p2 = scmp.ne.s32.totalorder %s548_s3, %s402_s22  ;;  %p406_p3 = scmp.lt.u32.totalorder %s402_s22, %s548_s3 }
  0x27   :  { %p408_p4 = pnand %p406_p3, %p403_p2 }
  0x29   :  { %411 = shalt.err (!%p408_p4)
}
  0x2a   :  { %s412_s27 = scalar_lea.vmem %s43_s10, 1536  ;;  %p417_p6 = scmp.lt.s32.totalorder %s43_s10, %s43_s10 }
  0x2b   :  { %p413_p5 = scmp.ne.s32.totalorder %s43_s10, %s412_s27  ;;  %p418_p7 = scmp.lt.s32.totalorder %s412_s27, %s412_s27 }
  0x2d   :  { %p419_p8 = por %p418_p7, %p417_p6 }
  0x2f   :  { %p420_p9 = pnand %p419_p8, %p413_p5 }
  0x31   :  { %423 = shalt.err (!%p420_p9)
}
  0x32   :  { %s457_s0 = smov 64   ;;  %s458_s28 = smov 4  }
  0x33   :  { %48 = dma.hbm_to_vmem [thread:$0]  %s548_s3, 1536, %s43_s10, [#allocation6], %s457_s0, %s457_s0, %s458_s28  }
  0x34   :  { %446 = dma.done.wait [#allocation3], 32  }
  0x35   :  { %447 = vsyncadd [#allocation3], 4294967264 }
  0x36   :  { %448 = dma.done.wait [#allocation6], 2048  }
  0x37   :  { %449 = vsyncadd [#allocation6], 4294965248  ;;  %v459_v0 = vmov 0   ;;  %v340_v1 = vld [vmem:[#allocation5 + $0x4] ss:$8 sps:$4 sm:$0xff]   ;;  %vm99_vm0 = vcmask 261120   ;;  %v69_v19 = vlaneseq }
  0x38   :  { %135 = vmatprep.mubr.bf16.mxu0 %v459_v0  ;;  %255 = vmatprep.subr.bf16.mxu1 %v459_v0  ;;  %v342_v2 = vld [vmem:[#allocation5] ss:$8 sps:$4 sm:$0xff]   ;;  %v343_v3 = vld [vmem:[#allocation5 + $0x14] ss:$8 sps:$4 sm:$0xff]   ;;  %v345_v4 = vld [vmem:[#allocation5 + $0x10] ss:$8 sps:$4 sm:$0xff]  }
  0x39   :  { %103 = vmatprep.subr.bf16.mxu0 %v340_v1  ;;  %v61_v5 = vld [vmem:[#allocation2] sm:$0x3]  ;;  %v346_v6 = vld [vmem:[#allocation7] sm:$0xff]   ;;  %v347_v7 = vld [vmem:[#allocation7 + $0x8] sm:$0xff]   ;;  %v70_v20 = vshrl.u32 %v69_v19, 7  ;;  %vm251_vm1 = vcmask 523264  }
  0x3a   :  { %104 = vmatpush1.bf16.msra.mxu0 %v342_v2  ;;  %256 = vmatpush1.bf16.msra.mxu1 %v346_v6  ;;  %v62_v8 = vpack.c.bf16 %v61_v5, %v61_v5  ;;  %v348_v9 = vld [vmem:[#allocation7 + $0x10] sm:$0xff]   ;;  %v349_v10 = vld [vmem:[#allocation7 + $0x18] sm:$0xff]   ;;  %v350_v11 = vld [vmem:[#allocation7 + $0x20] sm:$0xff]  }
  0x3b   :  { %105 = vmatprep.subr.bf16.mxu0 %v343_v3  ;;  %257 = vmatprep.subr.bf16.mxu1 %v459_v0  ;;  %v351_v12 = vld [vmem:[#allocation7 + $0x28] sm:$0xff]   ;;  %v352_v13 = vld [vmem:[#allocation7 + $0x30] sm:$0xff]   ;;  %v353_v14 = vld [vmem:[#allocation7 + $0x38] sm:$0xff]   ;;  %v71_v21 = vsub.s32 0, %v70_v20  ;;  %v75_v23 = vsub.s32 1, %v70_v20 }
  0x3c   :  { %v354_v15 = vld [vmem:[#allocation7 + $0x40] sm:$0xff]   ;;  %v355_v16 = vld [vmem:[#allocation7 + $0x48] sm:$0xff]   ;;  %v356_v17 = vld [vmem:[#allocation7 + $0x50] sm:$0xff]  }
  0x3d   :  { %v357_v18 = vld [vmem:[#allocation7 + $0x58] sm:$0xff]  }
  0x3e   :  { %106 = vmatpush1.bf16.msra.mxu0 %v345_v4  ;;  %258 = vmatpush1.bf16.msra.mxu1 %v347_v7  ;;  %v67_v22 = vld [vmem:[%s547_s2] sm:$0x3]  ;;  %s460_s2 = smov [#allocation8]  }
  0x3f   :  { %259 = vmatprep.subr.bf16.mxu1 %v459_v0  ;;  %v72_v24 = vrot.slane %v67_v22, %v71_v21  ;;  %v76_v25 = vrot.slane %v67_v22, %v75_v23  ;;  %v317_v36 = vld [vmem:[%s549_s4] ss:$0 sm:$0xff]  ;;  %s302_s9 = sshll.u32 %s460_s2, 4  ;;  %s303_s9 = int_to_ptr.vmem [resolvable:$true] %s302_s9 }
  0x40   :  { %s424_s10 = scalar_lea.vmem %s303_s9, 32  ;;  %p429_p11 = scmp.lt.s32.totalorder %s303_s9, %s303_s9 }
  0x41   :  { %316 = vmatmul.mubr.msk.bf16.vlgmr.msra.gmra.mrb[0].mxu0 %vm99_vm0, %v62_v8  ;;  %p425_p10 = scmp.ne.s32.totalorder %s303_s9, %s424_s10  ;;  %p430_p12 = scmp.lt.s32.totalorder %s424_s10, %s424_s10 }
  0x42   :  { %260 = vmatpush1.bf16.msra.mxu1 %v348_v9 }
  0x43   :  { %261 = vmatprep.subr.bf16.mxu1 %v459_v0  ;;  %p431_p13 = por %p430_p12, %p429_p11 }
  0x45   :  { %p432_p0 = pnand %p431_p13, %p425_p10 }
  0x46   :  { %262 = vmatpush1.bf16.msra.mxu1 %v349_v10 }
  0x47   :  { %263 = vmatprep.subr.bf16.mxu1 %v459_v0 }
  0x4a   :  { %264 = vmatpush1.bf16.msra.mxu1 %v350_v11 }
  0x4b   :  { %265 = vmatprep.subr.bf16.mxu1 %v459_v0 }
  0x4e   :  { %266 = vmatpush1.bf16.msra.mxu1 %v351_v12 }
  0x4f   :  { %267 = vmatprep.subr.bf16.mxu1 %v459_v0 }
  0x52   :  { %268 = vmatpush1.bf16.msra.mxu1 %v352_v13 }
  0x53   :  { %269 = vmatprep.subr.bf16.mxu1 %v459_v0 }
  0x56   :  { %270 = vmatpush1.bf16.msra.mxu1 %v353_v14 }
  0x57   :  { %271 = vmatprep.subr.bf16.mxu1 %v459_v0 }
  0x5a   :  { %272 = vmatpush1.bf16.msra.mxu1 %v354_v15 }
  0x5b   :  { %273 = vmatprep.subr.bf16.mxu1 %v459_v0 }
  0x5e   :  { %274 = vmatpush1.bf16.msra.mxu1 %v355_v16 }
  0x5f   :  { %275 = vmatprep.subr.bf16.mxu1 %v459_v0 }
  0x62   :  { %276 = vmatpush1.bf16.msra.mxu1 %v356_v17 }
  0x63   :  { %277 = vmatprep.subr.bf16.mxu1 %v459_v0 }
  0x66   :  { %278 = vmatpush1.bf16.msra.mxu1 %v357_v18 }
 0x114   :  { %v137_v26 = vpop.f32.mrb[0].mxu0 }
 0x115   :  { %v138_v27 = vadd.f32 %v137_v26, %v72_v24  ;;  %v139_v28 = vpop.f32.mrb[1].mxu0 }
 0x116   :  { %v140_v29 = vadd.f32 %v139_v28, %v76_v25  ;;  %v141_v30 = vpop.f32.mrb[2].mxu0 }
 0x117   :  { %v144_v31 = vmax.f32 %v138_v27, 0.0  ;;  %v142_v32 = vpop.f32.mrb[3].mxu0 }
 0x118   :  { %v145_v33 = vmax.f32 %v140_v29, 0.0 }
 0x119   :  { %v146_v35 = vpack.c.bf16 %v144_v31, %v144_v31 }
 0x11a   :  { %v147_v34 = vpack.c.bf16 %v145_v33, %v145_v33 }
 0x11c   :  { %330 = vmatprep.mubr.msk.bf16.mxu1 %vm251_vm1, %v147_v34 }
 0x11d   :  { %288 = vmatmul.mubr.bf16.vlgmr.msra.gmra.mrb[0].mxu1 %v146_v35 }
 0x1f0   :  { %v289_v37 = vpop.f32.mrb[0].mxu1 }
 0x1f1   :  { %v290_v38 = vadd.f32 %v317_v36, %v289_v37  ;;  %v291_v39 = vpop.f32.mrb[1].mxu1 }
 0x1f2   :  { %v292_v40 = vpop.f32.mrb[2].mxu1 }
 0x1f3   :  { %295 = vst [vmem:[#allocation8] sm:$0x3] %v290_v38  ;;  %v293_v41 = vpop.f32.mrb[3].mxu1 }
 0x1f4   :  { %435 = shalt.err (!%p432_p0)
}
 0x1f5   :  { %s436_s4 = scalar_lea.hbm %s550_s5, 32 }
 0x1f6   :  { %p437_p1 = scmp.ne.s32.totalorder %s550_s5, %s436_s4  ;;  %p440_p2 = scmp.lt.u32.totalorder %s436_s4, %s550_s5 }
 0x1f8   :  { %p442_p3 = pnand %p440_p2, %p437_p1 }
 0x1fa   :  { %445 = shalt.err (!%p442_p3)
}
 0x1fb   :  { %305 = dma.vmem_to_hbm [thread:$0]  %s303_s9, 32, %s550_s5, [#allocation4]  }
 0x1fc   :  { %450 = dma.done.wait [#allocation4], 32  }
 0x1fd   :  { %451 = vsyncadd [#allocation4], 4294967264 }
 0x1fe   :  { %309 = vsyncpa [#allocation3], 1 }
 0x1ff   :  { %310 = vsyncpa [#allocation6], 1 }
 0x200   :  { %311 = vsyncpa [#allocation4], 1 }

</bundles_post_ra>
